<compile_context>
chip_gen: v5e
topology: v5e:2x2
jax: 0.10.0
libtpu: 0.0.40
codegen_flags: <defaults>
</compile_context>

<pallas_src>
import functools

import jax
import jax.numpy as jnp
import numpy as np
from jax import lax
from jax.experimental import pallas as pl
from jax.experimental.pallas import tpu as pltpu

_LANES = 128                       # TPU lane width (last dim of a vreg)
_TARGET_TILE_BYTES = 2 * 1024 * 1024   # per in/out buffer; 4 buffers (dbl-buffered)
                                       # = 8 MiB, fits v5e's 16 MiB scoped VMEM
_BIG_ROW_BYTES = 512 * 1024        # a single row this big gets its own grid steps


def _sublane_multiple(dtype):
    """Sublane packing multiple for a dtype: 8 (4B), 16 (2B), 32 (1B)."""
    itemsize = jnp.dtype(dtype).itemsize
    return max(8, 32 // max(int(itemsize), 1))


def _tile_rows(budget_rows, total_rows, sub):
    """Row-block size: either the full dim, or a multiple of `sub` within budget."""
    if budget_rows >= total_rows or total_rows <= sub:
        return total_rows
    return max((min(budget_rows, total_rows) // sub) * sub, sub)


# ----------------------------------------------------------------------------
# Kernels
# ----------------------------------------------------------------------------
def _scale_rows_kernel(x_ref, s_ref, o_ref):
    """(block_n, block_f) tile times per-row f32 scale column (block_n, 1)."""
    o_ref[...] = (x_ref[...] * s_ref[...]).astype(o_ref.dtype)


def _big_row_kernel(mask_ref, x_ref, o_ref, *, inv_survival):
    """Per-row keep/drop for huge rows. x tile: (1, block_s, 128); mask: SMEM i32[N]."""
    row = pl.program_id(0)
    scale = jnp.where(mask_ref[row] > 0, inv_survival, 0.0).astype(jnp.float32)
    o_ref[...] = (x_ref[...] * scale).astype(o_ref.dtype)


def _const_scale_kernel(x_ref, o_ref, *, scale):
    """Whole-tensor keep path: multiply by a compile-time constant scale."""
    o_ref[...] = (x_ref[...] * jnp.float32(scale)).astype(o_ref.dtype)


# ----------------------------------------------------------------------------
# Pallas wrappers
# ----------------------------------------------------------------------------
def _pick_2d_blocks(N, F, itemsize, sub):
    """Byte-budgeted (block_n, block_f) for a 2-D (N, F) view."""
    if F * itemsize <= _TARGET_TILE_BYTES:
        block_f = F
    else:
        block_f = max(((_TARGET_TILE_BYTES // itemsize) // _LANES) * _LANES, _LANES)
    budget_rows = max(_TARGET_TILE_BYTES // max(block_f * itemsize, 1), 1)
    block_n = _tile_rows(budget_rows, N, sub)
    return block_n, block_f


def _scale_rows_2d(x2, scale_col):
    """Row mode, general path: (N, F) tiles * per-row f32 scale column."""
    N, F = x2.shape
    itemsize = int(x2.dtype.itemsize)
    sub = _sublane_multiple(x2.dtype)
    block_n, block_f = _pick_2d_blocks(N, F, itemsize, sub)
    grid = (pl.cdiv(N, block_n), pl.cdiv(F, block_f))
    return pl.pallas_call(
        _scale_rows_kernel,
        out_shape=jax.ShapeDtypeStruct((N, F), x2.dtype),
        grid_spec=pltpu.PrefetchScalarGridSpec(
            num_scalar_prefetch=0,
            grid=grid,
            in_specs=[
                pl.BlockSpec((block_n, block_f), lambda i, j: (i, j)),
                pl.BlockSpec((block_n, 1), lambda i, j: (i, 0)),
            ],
            out_specs=pl.BlockSpec((block_n, block_f), lambda i, j: (i, j)),
        ),
        compiler_params=pltpu.CompilerParams(
            dimension_semantics=("parallel", "parallel")),
        cost_estimate=pl.CostEstimate(
            flops=N * F, transcendentals=0,
            bytes_accessed=2 * N * F * itemsize + N * 4),
    )(x2, scale_col)


def _const_scale_dense(x, scale):
    """Batch keep path when total size is 128-friendly: (T//128, 128) view."""
    total = int(x.size)
    R = total // _LANES
    itemsize = int(x.dtype.itemsize)
    sub = _sublane_multiple(x.dtype)
    block_r = _tile_rows(max(_TARGET_TILE_BYTES // (_LANES * itemsize), 1), R, sub)
    xd = x.reshape(R, _LANES)
    grid = (pl.cdiv(R, block_r),)
    out = pl.pallas_call(
        functools.partial(_const_scale_kernel, scale=scale),
        out_shape=jax.ShapeDtypeStruct((R, _LANES), x.dtype),
        grid_spec=pltpu.PrefetchScalarGridSpec(
            num_scalar_prefetch=0,
            grid=grid,
            in_specs=[pl.BlockSpec((block_r, _LANES), lambda i: (i, 0))],
            out_specs=pl.BlockSpec((block_r, _LANES), lambda i: (i, 0)),
        ),
        compiler_params=pltpu.CompilerParams(dimension_semantics=("parallel",)),
        cost_estimate=pl.CostEstimate(
            flops=total, transcendentals=0,
            bytes_accessed=2 * total * itemsize),
    )(xd)
    return out.reshape(x.shape)


def _const_scale_2d(x2, scale):
    """Batch keep path for odd sizes: (N, F) view, constant scale."""
    N, F = x2.shape
    itemsize = int(x2.dtype.itemsize)
    sub = _sublane_multiple(x2.dtype)
    block_n, block_f = _pick_2d_blocks(N, F, itemsize, sub)
    grid = (pl.cdiv(N, block_n), pl.cdiv(F, block_f))
    return pl.pallas_call(
        functools.partial(_const_scale_kernel, scale=scale),
        out_shape=jax.ShapeDtypeStruct((N, F), x2.dtype),
        grid_spec=pltpu.PrefetchScalarGridSpec(
            num_scalar_prefetch=0,
            grid=grid,
            in_specs=[pl.BlockSpec((block_n, block_f), lambda i, j: (i, j))],
            out_specs=pl.BlockSpec((block_n, block_f), lambda i, j: (i, j)),
        ),
        compiler_params=pltpu.CompilerParams(
            dimension_semantics=("parallel", "parallel")),
        cost_estimate=pl.CostEstimate(
            flops=N * F, transcendentals=0,
            bytes_accessed=2 * N * F * itemsize),
    )(x2)


def _big_row_3d(x3, mask_i32, inv_survival):
    """Row mode, huge rows: sublane-dense (N, S, 128) view, one row per grid step."""
    N, S, _ = x3.shape
    itemsize = int(x3.dtype.itemsize)
    sub = _sublane_multiple(x3.dtype)
    block_s = _tile_rows(max(_TARGET_TILE_BYTES // (_LANES * itemsize), 1), S, sub)
    grid = (N, pl.cdiv(S, block_s))
    return pl.pallas_call(
        functools.partial(_big_row_kernel, inv_survival=inv_survival),
        out_shape=jax.ShapeDtypeStruct((N, S, _LANES), x3.dtype),
        grid_spec=pltpu.PrefetchScalarGridSpec(
            num_scalar_prefetch=1,
            grid=grid,
            in_specs=[pl.BlockSpec((1, block_s, _LANES), lambda i, j, m: (i, j, 0))],
            out_specs=pl.BlockSpec((1, block_s, _LANES), lambda i, j, m: (i, j, 0)),
        ),
        compiler_params=pltpu.CompilerParams(
            dimension_semantics=("parallel", "parallel")),
        cost_estimate=pl.CostEstimate(
            flops=N * S * _LANES, transcendentals=0,
            bytes_accessed=2 * N * S * _LANES * itemsize),
    )(mask_i32, x3)


# ----------------------------------------------------------------------------
# Public API
# ----------------------------------------------------------------------------
def stochastic_depth_pallas(x, key, p: float, mode: str, training: bool = True):
    """Pallas implementation of torchvision.ops.stochastic_depth.

    x:   jnp array of shape (N, ...) (any trailing dims, e.g. NCHW), float dtype.
    key: jax PRNG key for the Bernoulli draw (PyTorch uses its own RNG, so
         bit-exact randomness is not reproducible; semantics are identical).
    """
    if p < 0.0 or p > 1.0:
        raise ValueError(f"drop probability has to be between 0 and 1, but got {p}")
    if mode not in ("batch", "row"):
        raise ValueError(f"mode has to be either 'batch' or 'row', but got {mode}")
    if not training or p == 0.0:
        return x
    if x.size == 0:
        return x
    # TODO(synk): integer dtypes would silently truncate the 1/(1-p) scale;
    # only floating inputs are supported (matches practical torchvision use).

    survival_rate = 1.0 - p
    inv_survival = (1.0 / survival_rate) if survival_rate > 0.0 else 0.0

    orig_shape = x.shape
    N = int(orig_shape[0])
    F = int(np.prod(orig_shape[1:])) if x.ndim > 1 else 1
    itemsize = int(x.dtype.itemsize)

    if mode == "row":
        mask = jax.random.bernoulli(key, survival_rate, (N,))
        row_bytes = F * itemsize
        if F % _LANES == 0 and row_bytes >= _BIG_ROW_BYTES:
            # Huge rows: sublane-dense per-row path with SMEM keep/drop scalar.
            out = _big_row_3d(x.reshape(N, F // _LANES, _LANES),
                              mask.astype(jnp.int32), inv_survival)
            return out.reshape(orig_shape)
        # General path: many rows per block, per-row f32 scale (inv_survival folded).
        scale_col = (mask.astype(jnp.float32) * inv_survival).reshape(N, 1)
        out = _scale_rows_2d(x.reshape(N, F), scale_col)
        return out.reshape(orig_shape)

    # mode == "batch": one keep/drop decision for the whole tensor.
    keep = jax.random.bernoulli(key, survival_rate, ())
    total = N * F

    def _kept(xx):
        if total % _LANES == 0:
            return _const_scale_dense(xx, inv_survival)
        return _const_scale_2d(xx.reshape(N, F), inv_survival).reshape(orig_shape)

    def _dropped(xx):
        # Dropped branch: one HBM pass (write zeros), no read of x at all.
        return jnp.zeros_like(xx)

    return lax.cond(keep, _kept, _dropped, x)


class StochasticDepth:
    """JAX/Pallas mirror of torchvision's StochasticDepth module."""

    def __init__(self, p: float, mode: str):
        self.p = p
        self.mode = mode
        self.training = True

    def __call__(self, x, key):
        return stochastic_depth_pallas(x, key, self.p, self.mode, self.training)

    def __repr__(self):
        return f"StochasticDepth(p={self.p}, mode={self.mode})"


if __name__ == "__main__":
    key = jax.random.PRNGKey(0)
    k_data, k_row, k_batch, k_big = jax.random.split(key, 4)

    # Small NCHW-like input: batch=2, channels=4, spatial=16x16  (F = 1024)
    x = jax.random.normal(k_data, (2, 4, 16, 16), dtype=jnp.float32)

    # --- mode="row", training=True (2-D lane-dense path with scale column) ---
    p_row = 0.3
    surv_row = 1.0 - p_row
    y_row = jax.block_until_ready(StochasticDepth(p=p_row, mode="row")(x, k_row))
    mask_row = jax.random.bernoulli(k_row, surv_row, (2,)).astype(jnp.float32)
    ref_row = x * (mask_row * (1.0 / surv_row)).reshape(2, 1, 1, 1)
    np.testing.assert_allclose(np.asarray(y_row), np.asarray(ref_row),
                               rtol=1e-5, atol=1e-6)

    # --- mode="batch", training=True (lax.cond + constant-scale dense path) ---
    p_b = 0.5
    surv_b = 1.0 - p_b
    y_batch = jax.block_until_ready(StochasticDepth(p=p_b, mode="batch")(x, k_batch))
    keep_b = jax.random.bernoulli(k_batch, surv_b, ()).astype(jnp.float32)
    ref_batch = x * (keep_b * (1.0 / surv_b))
    np.testing.assert_allclose(np.asarray(y_batch), np.asarray(ref_batch),
                               rtol=1e-5, atol=1e-6)

    # --- eval mode: identity passthrough ---
    mod_eval = StochasticDepth(p=0.9, mode="row")
    mod_eval.training = False
    y_eval = jax.block_until_ready(mod_eval(x, k_row))
    np.testing.assert_allclose(np.asarray(y_eval), np.asarray(x), rtol=0, atol=0)

    # --- generic fallback path (feature count not a multiple of 128) ---
    x_odd = jax.random.normal(k_data, (4, 3, 5, 7), dtype=jnp.float32)  # F = 105
    p_odd = 0.2
    surv_odd = 1.0 - p_odd
    y_odd = jax.block_until_ready(StochasticDepth(p=p_odd, mode="row")(x_odd, k_row))
    mask_odd = jax.random.bernoulli(k_row, surv_odd, (4,)).astype(jnp.float32)
    ref_odd = x_odd * (mask_odd * (1.0 / surv_odd)).reshape(4, 1, 1, 1)
    np.testing.assert_allclose(np.asarray(y_odd), np.asarray(ref_odd),
                               rtol=1e-5, atol=1e-6)

    # --- big-row path (row >= 512 KiB -> per-row 3-D sublane-dense path) ---
    x_big = jax.random.normal(k_data, (2, 256, 512), dtype=jnp.float32)  # 512 KiB/row
    p_big = 0.4
    surv_big = 1.0 - p_big
    y_big = jax.block_until_ready(StochasticDepth(p=p_big, mode="row")(x_big, k_big))
    mask_big = jax.random.bernoulli(k_big, surv_big, (2,)).astype(jnp.float32)
    ref_big = x_big * (mask_big * (1.0 / surv_big)).reshape(2, 1, 1)
    np.testing.assert_allclose(np.asarray(y_big), np.asarray(ref_big),
                               rtol=1e-5, atol=1e-6)

    print("KERNEL_OK")
</pallas_src>

<mosaic_0001>
module attributes {stable_mosaic.version = 11 : i64} {
  func.func @_scale_rows_kernel(%arg0: i32, %arg1: i32, %arg2: memref<2x1024xf32, #tpu.memory_space<vmem>>, %arg3: memref<2x1xf32, #tpu.memory_space<vmem>>, %arg4: memref<2x1024xf32, #tpu.memory_space<vmem>>) attributes {dimension_semantics = [#tpu.dimension_semantics<parallel>, #tpu.dimension_semantics<parallel>], iteration_bounds = array<i64: 1, 1>, scalar_prefetch = 0 : i64, scratch_operands = 0 : i64, tpu.core_type = #tpu.core_type<tc>, window_params = [{transform_indices = @transform_0, window_bounds = array<i64: 2, 1024>}, {transform_indices = @transform_1, window_bounds = array<i64: 2, 1>}, {transform_indices = @transform_2, window_bounds = array<i64: 2, 1024>}]} {
    %c0 = arith.constant 0 : index
    %c0_0 = arith.constant 0 : index
    %0 = vector.load %arg2[%c0, %c0_0] : memref<2x1024xf32, #tpu.memory_space<vmem>>, vector<2x1024xf32>
    %c0_1 = arith.constant 0 : index
    %c0_2 = arith.constant 0 : index
    %1 = vector.load %arg3[%c0_1, %c0_2] : memref<2x1xf32, #tpu.memory_space<vmem>>, vector<2x1xf32>
    %2 = vector.broadcast %1 : vector<2x1xf32> to vector<2x1024xf32>
    %3 = arith.mulf %0, %2 : vector<2x1024xf32>
    %c0_3 = arith.constant 0 : index
    %c0_4 = arith.constant 0 : index
    %4 = vector.load %arg4[%c0_3, %c0_4] : memref<2x1024xf32, #tpu.memory_space<vmem>>, vector<2x1024xf32>
    tpu.vector_store %arg4[%c0_3, %c0_4], %3 {strides = array<i32>} : memref<2x1024xf32, #tpu.memory_space<vmem>>, vector<2x1024xf32>,
    return
  }
  func.func @transform_0(%arg0: i32, %arg1: i32) -> (i32, i32) {
    %c0_i32 = arith.constant 0 : i32
    return %arg0, %arg1 : i32, i32
  }
  func.func @transform_1(%arg0: i32, %arg1: i32) -> (i32, i32) {
    %c0_i32 = arith.constant 0 : i32
    %c0_i32_0 = arith.constant 0 : i32
    return %arg0, %c0_i32 : i32, i32
  }
  func.func @transform_2(%arg0: i32, %arg1: i32) -> (i32, i32) {
    %c0_i32 = arith.constant 0 : i32
    return %arg0, %arg1 : i32, i32
  }
}

</mosaic_0001>

<bundles_post_ra>
// kernel: tpu_custom_call.1
= control target key start
LH: loop header
LB: loop body
LE: loop exit
PB: predicated region body
PF: predicated region fallthrough
CT: control target
= control target key end

     0   :  { %7 = vsyncpa [#allocation3], 0  ;;  %s144_s0 = inlined_call_operand.hbm [shape: f32[2,1024], index: 0, kind: input, shape index: {}]   ;;  %s145_s1 = inlined_call_operand.vmem [shape: f32[2,1], index: 1, kind: input, shape index: {}]   ;;  %s146_s2 = inlined_call_operand.hbm [shape: f32[2,1024], index: 2, kind: output, shape index: {}]  }
   0x1   :  { %8 = vsyncpa [#allocation4], 0  ;;  %s14_s11 = sshll.u32 %s144_s0, 4  ;;  %s116_s12 = smov [#allocation2]   ;;  %s15_s11 = int_to_ptr.hbm [resolvable:$true] %s14_s11 }
   0x2   :  { %s16_s13 = sshll.u32 %s116_s12, 4  ;;  %s17_s13 = int_to_ptr.vmem [resolvable:$true] %s16_s13 }
   0x3   :  { %19 = dma.hbm_to_vmem [thread:$0]  %s15_s11, 256, %s17_s13, [#allocation3]  }
   0x4   :  { %112 = dma.done.wait [#allocation3], 256  }
   0x5   :  { %113 = vsyncadd [#allocation3], 4294967040  ;;  %v117_v0 = vmov 0   ;;  %v28_v1 = vld [vmem:[%s145_s1] sm:$0x3]  ;;  %v27_v7 = vld [vmem:[#allocation2 + $0x8] sm:$0xff] }
   0x6   :  { %63 = vset.pattern.permute.xlu0 %v117_v0  ;;  %v118_v2 = vmov 269488144   ;;  %v26_v6 = vld [vmem:[#allocation2] sm:$0xff]  ;;  %s119_s0 = smov [#allocation5]   ;;  %s49_s19 = sshll.u32 %s146_s2, 4  ;;  %s50_s19 = int_to_ptr.hbm [resolvable:$true] %s49_s19 }
   0x7   :  { %31 = vperm.xlu0 %63, %v28_v1   ;;  %v34_v3 = vunpack.c.l.s4 %v118_v2  ;;  %s47_s16 = sshll.u32 %s119_s0, 4  ;;  %s48_s16 = int_to_ptr.vmem [resolvable:$true] %s47_s16 }
   0x9   :  { %v35_v4 = vunpack.c.0.s8 %v34_v3 }
  0x79   :  { %v32_v5 = vpop.permute.xlu0 %31 }
  0x7a   :  { %v36_v8 = vperm.slane %v32_v5, %v35_v4 }
  0x7c   :  { %v38_v9 = vmul.f32 %v36_v8, %v26_v6  ;;  %v39_v10 = vmul.f32 %v36_v8, %v27_v7 }
  0x7e   :  { %40 = vst [vmem:[#allocation5] sm:$0xff] %v38_v9 }
  0x7f   :  { %41 = vst [vmem:[#allocation5 + $0x8] sm:$0xff] %v39_v10 }
  0x80   :  { %52 = dma.vmem_to_hbm [thread:$0]  %s48_s16, 256, %s50_s19, [#allocation4]  }
  0x81   :  { %114 = dma.done.wait [#allocation4], 256  }
  0x82   :  { %115 = vsyncadd [#allocation4], 4294967040 }
  0x83   :  { %57 = vsyncpa [#allocation3], 1 }
  0x84   :  { %58 = vsyncpa [#allocation4], 1 }

</bundles_post_ra>
